<compile_context>
chip_gen: v5e
topology: v5e:2x2
jax: 0.10.0
libtpu: 0.0.40
codegen_flags: <defaults>
</compile_context>

<pallas_src>
import functools
import math

import jax
import jax.numpy as jnp
from jax import lax
from jax.experimental import pallas as pl
from jax.experimental.pallas import tpu as pltpu


def _mha_kernel(xq_ref, xk_ref, y_ref,
                wq_ref, bq_ref, wk_ref, bk_ref, wv_ref, bv_ref,
                wo_ref, bo_ref,
                out_ref, *maybe_scores,
                n_heads, dim_k, dim_v, norm_fact,
                compute_dtype, exp_dtype, approx_recip):
    """One grid step == one (batch, query-tile) pair. Heads unrolled in-kernel."""
    scores_ref = maybe_scores[0] if maybe_scores else None
    f32 = jnp.float32

    xq = xq_ref[0]        # (tq, D) compute_dtype  -- query rows of this tile
    xk = xk_ref[0]        # (L,  D) compute_dtype  -- all key rows
    yv = y_ref[0]         # (L,  D) compute_dtype  -- all value rows

    # Fused, wide-N QKV projections on the MXU with f32 accumulation.
    # Bias add + scale stay in f32; one boundary cast feeds the next MXU op.
    q_all = jnp.dot(xq, wq_ref[...], preferred_element_type=f32) + bq_ref[...]
    q_all = (q_all * norm_fact).astype(compute_dtype)           # (tq, H*dk)
    k_all = (jnp.dot(xk, wk_ref[...], preferred_element_type=f32)
             + bk_ref[...]).astype(compute_dtype)               # (L,  H*dk)
    v_all = (jnp.dot(yv, wv_ref[...], preferred_element_type=f32)
             + bv_ref[...]).astype(compute_dtype)               # (L,  H*dv)

    pv_heads = []
    for h in range(n_heads):                       # static unroll; H is small
        q = q_all[:, h * dim_k:(h + 1) * dim_k]    # static lane slices
        k = k_all[:, h * dim_k:(h + 1) * dim_k]
        v = v_all[:, h * dim_v:(h + 1) * dim_v]

        # s[l, s'] = sum_e q[l, e] * k[s', e] -- contract last dims, no transpose.
        s = lax.dot_general(q, k, (((1,), (1,)), ((), ())),
                            preferred_element_type=f32)         # (tq, L) f32

        # Numerically-stable softmax; statistics kept in f32.
        s_max = jnp.max(s, axis=-1, keepdims=True)
        st = s - s_max
        if exp_dtype is not None and jnp.dtype(exp_dtype) != jnp.dtype(f32):
            e = jnp.exp(st.astype(exp_dtype)).astype(f32)       # bf16 EUP exp (v6e/v7x)
        else:
            e = jnp.exp(st)
        denom = jnp.sum(e, axis=-1, keepdims=True)
        if approx_recip:
            p = e * pl.reciprocal(denom, approx=True)           # EUP slot
        else:
            p = e / denom                                       # exact: probs leave kernel

        p_c = p.astype(compute_dtype)
        if scores_ref is not None:
            if jnp.dtype(scores_ref.dtype) == jnp.dtype(compute_dtype):
                scores_ref[0, h] = p_c                          # reuse the single cast
            else:
                scores_ref[0, h] = p.astype(scores_ref.dtype)

        pv_heads.append(jnp.dot(p_c, v, preferred_element_type=f32))  # (tq, dv)

    # One full-depth output projection: (tq, H*dv) @ (H*dv, D) + bias.
    pv = jnp.concatenate(pv_heads, axis=-1).astype(compute_dtype)     # (tq, H*dv)
    out = jnp.dot(pv, wo_ref[...], preferred_element_type=f32) + bo_ref[...]
    out_ref[0] = out.astype(out_ref.dtype)


def _choose_q_tile(L, q_tile, tq_max=256):
    if q_tile is not None:
        assert L % q_tile == 0, "q_tile must divide L"
        return q_tile
    if L <= tq_max:
        return L
    for cand in range(min(tq_max, L), 7, -1):       # largest mult-of-8 divisor
        if L % cand == 0 and cand % 8 == 0:
            return cand
    return L


def multihead_attention(x, y, params, *, d_model, dim_k, dim_v, n_heads,
                        compute_dtype=jnp.float32,
                        scores_dtype=jnp.float32,
                        exp_dtype=None,
                        emit_scores=True,
                        q_tile=None,
                        vmem_limit_bytes=None):
    """x, y: (B, L, d_model).  Returns (out, scores) or out if not emit_scores."""
    B, L, D = x.shape
    assert D == d_model
    H = n_heads
    norm_fact = 1.0 / math.sqrt(d_model)   # matches the PyTorch module

    wq, bq, wk, bk, wv, bv, wo, bo = params
    wq_c = wq.astype(compute_dtype)        # (D, H*dk)
    wk_c = wk.astype(compute_dtype)        # (D, H*dk)
    wv_c = wv.astype(compute_dtype)        # (D, H*dv)
    wo_c = wo.astype(compute_dtype)        # (H*dv, D)
    bq_f = bq.astype(jnp.float32)          # (1, H*dk)
    bk_f = bk.astype(jnp.float32)
    bv_f = bv.astype(jnp.float32)
    bo_f = bo.astype(jnp.float32)          # (1, D)

    xc = x.astype(compute_dtype)
    yc = y.astype(compute_dtype)

    tq = _choose_q_tile(L, q_tile)
    n_qt = L // tq

    # Exact divide when f32 probabilities are returned; EUP approx otherwise.
    approx_recip = (not emit_scores) or (jnp.dtype(scores_dtype) != jnp.dtype(jnp.float32))

    kernel = functools.partial(
        _mha_kernel,
        n_heads=H, dim_k=dim_k, dim_v=dim_v, norm_fact=norm_fact,
        compute_dtype=compute_dtype, exp_dtype=exp_dtype,
        approx_recip=approx_recip)

    def full_spec(arr):
        nd = arr.ndim
        return pl.BlockSpec(arr.shape, lambda b, qi, _nd=nd: (0,) * _nd)

    in_specs = [
        pl.BlockSpec((1, tq, D), lambda b, qi: (b, qi, 0)),   # x: query tile
        pl.BlockSpec((1, L, D), lambda b, qi: (b, 0, 0)),     # x: all key rows
        pl.BlockSpec((1, L, D), lambda b, qi: (b, 0, 0)),     # y: all value rows
        full_spec(wq_c), full_spec(bq_f),
        full_spec(wk_c), full_spec(bk_f),
        full_spec(wv_c), full_spec(bv_f),
        full_spec(wo_c), full_spec(bo_f),
    ]

    out_shapes = [jax.ShapeDtypeStruct((B, L, d_model), jnp.float32)]
    out_specs = [pl.BlockSpec((1, tq, D), lambda b, qi: (b, qi, 0))]
    if emit_scores:
        out_shapes.append(jax.ShapeDtypeStruct((B, H, L, L), scores_dtype))
        out_specs.append(pl.BlockSpec((1, H, tq, L), lambda b, qi: (b, 0, qi, 0)))

    # Explicit scoped-VMEM budget from the actual block bytes (the 16/32 MiB
    # defaults are hit long before physical VMEM at moderate L).
    if vmem_limit_bytes is None:
        cb = jnp.dtype(compute_dtype).itemsize
        blk = (tq * D + 2 * L * D) * cb                            # x tile + x + y
        blk += (2 * D * H * dim_k + 2 * D * H * dim_v) * cb        # Wq,Wk,Wv,Wo
        blk += (2 * H * dim_k + H * dim_v + D) * 4                 # biases (f32)
        blk += tq * D * 4                                          # out block
        if emit_scores:
            blk += H * tq * L * jnp.dtype(scores_dtype).itemsize   # scores block
        interm = (tq + 2 * L) * H * (dim_k + dim_v) * cb           # q/k/v_all
        interm += 4 * tq * L * 4 + tq * H * dim_v * 4              # softmax temps + pv
        vmem_limit_bytes = int(min(max(2 * blk + interm + (4 << 20), 32 << 20),
                                   100 << 20))

    fn = pl.pallas_call(
        kernel,
        out_shape=tuple(out_shapes),
        grid=(B, n_qt),
        in_specs=in_specs,
        out_specs=tuple(out_specs),
        compiler_params=pltpu.CompilerParams(
            dimension_semantics=("parallel", "parallel"),
            vmem_limit_bytes=vmem_limit_bytes,
        ),
    )

    results = fn(xc, xc, yc, wq_c, bq_f, wk_c, bk_f, wv_c, bv_f, wo_c, bo_f)
    if emit_scores:
        out, scores = results
        return out, scores
    (out,) = results
    return out


def _reference(x, y, params, *, d_model, dim_k, dim_v, n_heads):
    """Pure-JAX reference mirroring the PyTorch forward."""
    wq, bq, wk, bk, wv, bv, wo, bo = params
    B, L, _ = x.shape
    Q = (x @ wq + bq).reshape(B, L, n_heads, dim_k)
    K = (x @ wk + bk).reshape(B, L, n_heads, dim_k)
    V = (y @ wv + bv).reshape(B, L, n_heads, dim_v)
    scores = jnp.einsum('blhe,bshe->bhls', Q, K) * (1.0 / math.sqrt(d_model))
    scores = jax.nn.softmax(scores, axis=-1)
    output = jnp.einsum('bhls,bshd->blhd', scores, V).reshape(B, L, -1)
    return output @ wo + bo, scores


if __name__ == "__main__":
    # Small shapes consistent with the module's forward.
    B, L = 2, 16
    d_model = 32
    dim_k, dim_v = 16, 16
    n_heads = 2

    key = jax.random.PRNGKey(0)
    ks = jax.random.split(key, 10)

    # Deterministic synthetic parameters, (in, out) layout; biases as (1, out).
    wq = jax.random.normal(ks[0], (d_model, dim_k * n_heads), jnp.float32) * 0.1
    bq = jax.random.normal(ks[1], (1, dim_k * n_heads), jnp.float32) * 0.1
    wk = jax.random.normal(ks[2], (d_model, dim_k * n_heads), jnp.float32) * 0.1
    bk = jax.random.normal(ks[3], (1, dim_k * n_heads), jnp.float32) * 0.1
    wv = jax.random.normal(ks[4], (d_model, dim_v * n_heads), jnp.float32) * 0.1
    bv = jax.random.normal(ks[5], (1, dim_v * n_heads), jnp.float32) * 0.1
    wo = jax.random.normal(ks[6], (dim_v * n_heads, d_model), jnp.float32) * 0.1
    bo = jax.random.normal(ks[7], (1, d_model), jnp.float32) * 0.1
    params = (wq, bq, wk, bk, wv, bv, wo, bo)

    x = jax.random.normal(ks[8], (B, L, d_model), jnp.float32)
    y = jax.random.normal(ks[9], (B, L, d_model), jnp.float32)

    ref_out, ref_scores = _reference(
        x, y, params, d_model=d_model, dim_k=dim_k, dim_v=dim_v, n_heads=n_heads)

    cfg = dict(d_model=d_model, dim_k=dim_k, dim_v=dim_v, n_heads=n_heads)

    # --- A) f32, single query tile (tq = L), f32 scores: tight tolerance. ---
    out, scores = multihead_attention(x, y, params, **cfg)
    jax.block_until_ready((out, scores))
    assert jnp.allclose(out, ref_out, atol=2e-3, rtol=2e-3)
    assert jnp.allclose(scores, ref_scores, atol=2e-3, rtol=2e-3)

    # --- B) f32 with the query-tile grid axis exercised (tq = 8, 2 tiles). ---
    out_t, scores_t = multihead_attention(x, y, params, q_tile=8, **cfg)
    jax.block_until_ready((out_t, scores_t))
    assert jnp.allclose(out_t, ref_out, atol=2e-3, rtol=2e-3)
    assert jnp.allclose(scores_t, ref_scores, atol=2e-3, rtol=2e-3)

    # --- C) bf16 MXU operands + bf16 scores + bf16 exp (v6e/v7x fast path). ---
    out_bf, scores_bf = multihead_attention(
        x, y, params, q_tile=8, compute_dtype=jnp.bfloat16,
        scores_dtype=jnp.bfloat16, exp_dtype=jnp.bfloat16, **cfg)
    jax.block_until_ready((out_bf, scores_bf))
    assert jnp.allclose(out_bf, ref_out, atol=5e-2, rtol=5e-2)
    assert jnp.allclose(scores_bf.astype(jnp.float32), ref_scores, atol=5e-2, rtol=5e-2)

    # --- D) scores writeback elided entirely. ---
    out_only = multihead_attention(x, y, params, emit_scores=False, **cfg)
    jax.block_until_ready(out_only)
    assert jnp.allclose(out_only, ref_out, atol=2e-3, rtol=2e-3)

    print("KERNEL_OK")
</pallas_src>

<mosaic_0001>
module attributes {stable_mosaic.version = 11 : i64} {
  func.func @_mha_kernel(%arg0: i32, %arg1: i32, %arg2: memref<1x16x32xf32, #tpu.memory_space<vmem>>, %arg3: memref<1x16x32xf32, #tpu.memory_space<vmem>>, %arg4: memref<1x16x32xf32, #tpu.memory_space<vmem>>, %arg5: memref<32x32xf32, #tpu.memory_space<vmem>>, %arg6: memref<1x32xf32, #tpu.memory_space<vmem>>, %arg7: memref<32x32xf32, #tpu.memory_space<vmem>>, %arg8: memref<1x32xf32, #tpu.memory_space<vmem>>, %arg9: memref<32x32xf32, #tpu.memory_space<vmem>>, %arg10: memref<1x32xf32, #tpu.memory_space<vmem>>, %arg11: memref<32x32xf32, #tpu.memory_space<vmem>>, %arg12: memref<1x32xf32, #tpu.memory_space<vmem>>, %arg13: memref<1x16x32xf32, #tpu.memory_space<vmem>>, %arg14: memref<1x2x16x16xf32, #tpu.memory_space<vmem>>) attributes {dimension_semantics = [#tpu.dimension_semantics<parallel>, #tpu.dimension_semantics<parallel>], iteration_bounds = array<i64: 2, 1>, scalar_prefetch = 0 : i64, scratch_operands = 0 : i64, tpu.core_type = #tpu.core_type<tc>, window_params = [{transform_indices = @transform_0, window_bounds = array<i64: 1, 16, 32>}, {transform_indices = @transform_1, window_bounds = array<i64: 1, 16, 32>}, {transform_indices = @transform_2, window_bounds = array<i64: 1, 16, 32>}, {pipeline_mode = #tpu.pipeline_mode<synchronous>, transform_indices = @transform_3, window_bounds = array<i64: 32, 32>}, {pipeline_mode = #tpu.pipeline_mode<synchronous>, transform_indices = @transform_4, window_bounds = array<i64: 1, 32>}, {pipeline_mode = #tpu.pipeline_mode<synchronous>, transform_indices = @transform_5, window_bounds = array<i64: 32, 32>}, {pipeline_mode = #tpu.pipeline_mode<synchronous>, transform_indices = @transform_6, window_bounds = array<i64: 1, 32>}, {pipeline_mode = #tpu.pipeline_mode<synchronous>, transform_indices = @transform_7, window_bounds = array<i64: 32, 32>}, {pipeline_mode = #tpu.pipeline_mode<synchronous>, transform_indices = @transform_8, window_bounds = array<i64: 1, 32>}, {pipeline_mode = #tpu.pipeline_mode<synchronous>, transform_indices = @transform_9, window_bounds = array<i64: 32, 32>}, {pipeline_mode = #tpu.pipeline_mode<synchronous>, transform_indices = @transform_10, window_bounds = array<i64: 1, 32>}, {transform_indices = @transform_11, window_bounds = array<i64: 1, 16, 32>}, {transform_indices = @transform_12, window_bounds = array<i64: 1, 2, 16, 16>}]} {
    %c0 = arith.constant 0 : index
    %c0_0 = arith.constant 0 : index
    %c0_1 = arith.constant 0 : index
    %0 = vector.load %arg2[%c0, %c0_0, %c0_1] : memref<1x16x32xf32, #tpu.memory_space<vmem>>, vector<1x16x32xf32>
    %1 = vector.shape_cast %0 : vector<1x16x32xf32> to vector<16x32xf32>
    %c0_2 = arith.constant 0 : index
    %c0_3 = arith.constant 0 : index
    %c0_4 = arith.constant 0 : index
    %2 = vector.load %arg3[%c0_2, %c0_3, %c0_4] : memref<1x16x32xf32, #tpu.memory_space<vmem>>, vector<1x16x32xf32>
    %3 = vector.shape_cast %2 : vector<1x16x32xf32> to vector<16x32xf32>
    %c0_5 = arith.constant 0 : index
    %c0_6 = arith.constant 0 : index
    %c0_7 = arith.constant 0 : index
    %4 = vector.load %arg4[%c0_5, %c0_6, %c0_7] : memref<1x16x32xf32, #tpu.memory_space<vmem>>, vector<1x16x32xf32>
    %5 = vector.shape_cast %4 : vector<1x16x32xf32> to vector<16x32xf32>
    %c0_8 = arith.constant 0 : index
    %c0_9 = arith.constant 0 : index
    %6 = vector.load %arg5[%c0_8, %c0_9] : memref<32x32xf32, #tpu.memory_space<vmem>>, vector<32x32xf32>
    %cst = arith.constant dense<0.000000e+00> : vector<16x32xf32>
    %7 = tpu.matmul %1, %6, %cst {dimension_numbers = #tpu.dot_dimension_numbers<[1], [0], [0], [1], [0, 0, 1, 1], [], []>} : vector<16x32xf32>, vector<32x32xf32>, vector<16x32xf32> -> vector<16x32xf32>
    %c0_10 = arith.constant 0 : index
    %c0_11 = arith.constant 0 : index
    %8 = vector.load %arg6[%c0_10, %c0_11] : memref<1x32xf32, #tpu.memory_space<vmem>>, vector<1x32xf32>
    %9 = vector.broadcast %8 : vector<1x32xf32> to vector<16x32xf32>
    %10 = arith.addf %7, %9 : vector<16x32xf32>
    %cst_12 = arith.constant 0.176776692 : f32
    %11 = vector.broadcast %cst_12 : f32 to vector<16x32xf32>
    %12 = arith.mulf %10, %11 : vector<16x32xf32>
    %c0_13 = arith.constant 0 : index
    %c0_14 = arith.constant 0 : index
    %13 = vector.load %arg7[%c0_13, %c0_14] : memref<32x32xf32, #tpu.memory_space<vmem>>, vector<32x32xf32>
    %cst_15 = arith.constant dense<0.000000e+00> : vector<16x32xf32>
    %14 = tpu.matmul %3, %13, %cst_15 {dimension_numbers = #tpu.dot_dimension_numbers<[1], [0], [0], [1], [0, 0, 1, 1], [], []>} : vector<16x32xf32>, vector<32x32xf32>, vector<16x32xf32> -> vector<16x32xf32>
    %c0_16 = arith.constant 0 : index
    %c0_17 = arith.constant 0 : index
    %15 = vector.load %arg8[%c0_16, %c0_17] : memref<1x32xf32, #tpu.memory_space<vmem>>, vector<1x32xf32>
    %16 = vector.broadcast %15 : vector<1x32xf32> to vector<16x32xf32>
    %17 = arith.addf %14, %16 : vector<16x32xf32>
    %c0_18 = arith.constant 0 : index
    %c0_19 = arith.constant 0 : index
    %18 = vector.load %arg9[%c0_18, %c0_19] : memref<32x32xf32, #tpu.memory_space<vmem>>, vector<32x32xf32>
    %cst_20 = arith.constant dense<0.000000e+00> : vector<16x32xf32>
    %19 = tpu.matmul %5, %18, %cst_20 {dimension_numbers = #tpu.dot_dimension_numbers<[1], [0], [0], [1], [0, 0, 1, 1], [], []>} : vector<16x32xf32>, vector<32x32xf32>, vector<16x32xf32> -> vector<16x32xf32>
    %c0_21 = arith.constant 0 : index
    %c0_22 = arith.constant 0 : index
    %20 = vector.load %arg10[%c0_21, %c0_22] : memref<1x32xf32, #tpu.memory_space<vmem>>, vector<1x32xf32>
    %21 = vector.broadcast %20 : vector<1x32xf32> to vector<16x32xf32>
    %22 = arith.addf %19, %21 : vector<16x32xf32>
    %23 = vector.extract_strided_slice %12 {offsets = [0, 0], sizes = [16, 16], strides = [1, 1]} : vector<16x32xf32> to vector<16x16xf32>
    %24 = vector.extract_strided_slice %17 {offsets = [0, 0], sizes = [16, 16], strides = [1, 1]} : vector<16x32xf32> to vector<16x16xf32>
    %25 = vector.extract_strided_slice %22 {offsets = [0, 0], sizes = [16, 16], strides = [1, 1]} : vector<16x32xf32> to vector<16x16xf32>
    %cst_23 = arith.constant dense<0.000000e+00> : vector<16x16xf32>
    %26 = tpu.matmul %23, %24, %cst_23 {dimension_numbers = #tpu.dot_dimension_numbers<[1], [1], [0], [0], [0, 0, 1, 0], [], []>} : vector<16x16xf32>, vector<16x16xf32>, vector<16x16xf32> -> vector<16x16xf32>
    %cst_24 = arith.constant dense<0xFF800000> : vector<16xf32>
    %27 = vector.multi_reduction <maximumf>, %26, %cst_24 [1] : vector<16x16xf32> to vector<16xf32>
    %28 = vector.shape_cast %27 : vector<16xf32> to vector<16x1xf32>
    %29 = vector.broadcast %28 : vector<16x1xf32> to vector<16x16xf32>
    %30 = arith.subf %26, %29 : vector<16x16xf32>
    %31 = math.exp %30 : vector<16x16xf32>
    %cst_25 = arith.constant dense<0.000000e+00> : vector<16xf32>
    %32 = vector.multi_reduction <add>, %31, %cst_25 [1] : vector<16x16xf32> to vector<16xf32>
    %33 = vector.shape_cast %32 : vector<16xf32> to vector<16x1xf32>
    %34 = vector.broadcast %33 : vector<16x1xf32> to vector<16x16xf32>
    %35 = arith.divf %31, %34 : vector<16x16xf32>
    %c0_26 = arith.constant 0 : index
    %c0_27 = arith.constant 0 : index
    %c0_28 = arith.constant 0 : index
    %c0_29 = arith.constant 0 : index
    %36 = vector.load %arg14[%c0_26, %c0_27, %c0_28, %c0_29] : memref<1x2x16x16xf32, #tpu.memory_space<vmem>>, vector<1x1x16x16xf32>
    %37 = vector.shape_cast %36 : vector<1x1x16x16xf32> to vector<16x16xf32>
    %38 = vector.shape_cast %35 : vector<16x16xf32> to vector<1x1x16x16xf32>
    tpu.vector_store %arg14[%c0_26, %c0_27, %c0_28, %c0_29], %38 {strides = array<i32>} : memref<1x2x16x16xf32, #tpu.memory_space<vmem>>, vector<1x1x16x16xf32>,
    %cst_30 = arith.constant dense<0.000000e+00> : vector<16x16xf32>
    %39 = tpu.matmul %35, %25, %cst_30 {dimension_numbers = #tpu.dot_dimension_numbers<[1], [0], [0], [1], [0, 0, 1, 1], [], []>} : vector<16x16xf32>, vector<16x16xf32>, vector<16x16xf32> -> vector<16x16xf32>
    %40 = vector.extract_strided_slice %12 {offsets = [0, 16], sizes = [16, 16], strides = [1, 1]} : vector<16x32xf32> to vector<16x16xf32>
    %41 = vector.extract_strided_slice %17 {offsets = [0, 16], sizes = [16, 16], strides = [1, 1]} : vector<16x32xf32> to vector<16x16xf32>
    %42 = vector.extract_strided_slice %22 {offsets = [0, 16], sizes = [16, 16], strides = [1, 1]} : vector<16x32xf32> to vector<16x16xf32>
    %cst_31 = arith.constant dense<0.000000e+00> : vector<16x16xf32>
    %43 = tpu.matmul %40, %41, %cst_31 {dimension_numbers = #tpu.dot_dimension_numbers<[1], [1], [0], [0], [0, 0, 1, 0], [], []>} : vector<16x16xf32>, vector<16x16xf32>, vector<16x16xf32> -> vector<16x16xf32>
    %cst_32 = arith.constant dense<0xFF800000> : vector<16xf32>
    %44 = vector.multi_reduction <maximumf>, %43, %cst_32 [1] : vector<16x16xf32> to vector<16xf32>
    %45 = vector.shape_cast %44 : vector<16xf32> to vector<16x1xf32>
    %46 = vector.broadcast %45 : vector<16x1xf32> to vector<16x16xf32>
    %47 = arith.subf %43, %46 : vector<16x16xf32>
    %48 = math.exp %47 : vector<16x16xf32>
    %cst_33 = arith.constant dense<0.000000e+00> : vector<16xf32>
    %49 = vector.multi_reduction <add>, %48, %cst_33 [1] : vector<16x16xf32> to vector<16xf32>
    %50 = vector.shape_cast %49 : vector<16xf32> to vector<16x1xf32>
    %51 = vector.broadcast %50 : vector<16x1xf32> to vector<16x16xf32>
    %52 = arith.divf %48, %51 : vector<16x16xf32>
    %c0_34 = arith.constant 0 : index
    %c1 = arith.constant 1 : index
    %c0_35 = arith.constant 0 : index
    %c0_36 = arith.constant 0 : index
    %53 = vector.load %arg14[%c0_34, %c1, %c0_35, %c0_36] : memref<1x2x16x16xf32, #tpu.memory_space<vmem>>, vector<1x1x16x16xf32>
    %54 = vector.shape_cast %53 : vector<1x1x16x16xf32> to vector<16x16xf32>
    %55 = vector.shape_cast %52 : vector<16x16xf32> to vector<1x1x16x16xf32>
    tpu.vector_store %arg14[%c0_34, %c1, %c0_35, %c0_36], %55 {strides = array<i32>} : memref<1x2x16x16xf32, #tpu.memory_space<vmem>>, vector<1x1x16x16xf32>,
    %cst_37 = arith.constant dense<0.000000e+00> : vector<16x16xf32>
    %56 = tpu.matmul %52, %42, %cst_37 {dimension_numbers = #tpu.dot_dimension_numbers<[1], [0], [0], [1], [0, 0, 1, 1], [], []>} : vector<16x16xf32>, vector<16x16xf32>, vector<16x16xf32> -> vector<16x16xf32>
    %57 = tpu.concatenate %39, %56 in 1 : vector<16x16xf32>, vector<16x16xf32> -> vector<16x32xf32>
    %c0_38 = arith.constant 0 : index
    %c0_39 = arith.constant 0 : index
    %58 = vector.load %arg11[%c0_38, %c0_39] : memref<32x32xf32, #tpu.memory_space<vmem>>, vector<32x32xf32>
    %cst_40 = arith.constant dense<0.000000e+00> : vector<16x32xf32>
    %59 = tpu.matmul %57, %58, %cst_40 {dimension_numbers = #tpu.dot_dimension_numbers<[1], [0], [0], [1], [0, 0, 1, 1], [], []>} : vector<16x32xf32>, vector<32x32xf32>, vector<16x32xf32> -> vector<16x32xf32>
    %c0_41 = arith.constant 0 : index
    %c0_42 = arith.constant 0 : index
    %60 = vector.load %arg12[%c0_41, %c0_42] : memref<1x32xf32, #tpu.memory_space<vmem>>, vector<1x32xf32>
    %61 = vector.broadcast %60 : vector<1x32xf32> to vector<16x32xf32>
    %62 = arith.addf %59, %61 : vector<16x32xf32>
    %c0_43 = arith.constant 0 : index
    %c0_44 = arith.constant 0 : index
    %c0_45 = arith.constant 0 : index
    %63 = vector.load %arg13[%c0_43, %c0_44, %c0_45] : memref<1x16x32xf32, #tpu.memory_space<vmem>>, vector<1x16x32xf32>
    %64 = vector.shape_cast %63 : vector<1x16x32xf32> to vector<16x32xf32>
    %65 = vector.shape_cast %62 : vector<16x32xf32> to vector<1x16x32xf32>
    tpu.vector_store %arg13[%c0_43, %c0_44, %c0_45], %65 {strides = array<i32>} : memref<1x16x32xf32, #tpu.memory_space<vmem>>, vector<1x16x32xf32>,
    return
  }
  func.func @transform_0(%arg0: i32, %arg1: i32) -> (i32, i32, i32) {
    %c0_i32 = arith.constant 0 : i32
    %c0_i32_0 = arith.constant 0 : i32
    return %arg0, %arg1, %c0_i32 : i32, i32, i32
  }
  func.func @transform_1(%arg0: i32, %arg1: i32) -> (i32, i32, i32) {
    %c0_i32 = arith.constant 0 : i32
    %c0_i32_0 = arith.constant 0 : i32
    %c0_i32_1 = arith.constant 0 : i32
    return %arg0, %c0_i32, %c0_i32_0 : i32, i32, i32
  }
  func.func @transform_2(%arg0: i32, %arg1: i32) -> (i32, i32, i32) {
    %c0_i32 = arith.constant 0 : i32
    %c0_i32_0 = arith.constant 0 : i32
    %c0_i32_1 = arith.constant 0 : i32
    return %arg0, %c0_i32, %c0_i32_0 : i32, i32, i32
  }
  func.func @transform_3(%arg0: i32, %arg1: i32) -> (i32, i32) {
    %c0_i32 = arith.constant 0 : i32
    %c0_i32_0 = arith.constant 0 : i32
    %c0_i32_1 = arith.constant 0 : i32
    return %c0_i32, %c0_i32_0 : i32, i32
  }
  func.func @transform_4(%arg0: i32, %arg1: i32) -> (i32, i32) {
    %c0_i32 = arith.constant 0 : i32
    %c0_i32_0 = arith.constant 0 : i32
    %c0_i32_1 = arith.constant 0 : i32
    return %c0_i32, %c0_i32_0 : i32, i32
  }
  func.func @transform_5(%arg0: i32, %arg1: i32) -> (i32, i32) {
    %c0_i32 = arith.constant 0 : i32
    %c0_i32_0 = arith.constant 0 : i32
    %c0_i32_1 = arith.constant 0 : i32
    return %c0_i32, %c0_i32_0 : i32, i32
  }
  func.func @transform_6(%arg0: i32, %arg1: i32) -> (i32, i32) {
    %c0_i32 = arith.constant 0 : i32
    %c0_i32_0 = arith.constant 0 : i32
    %c0_i32_1 = arith.constant 0 : i32
    return %c0_i32, %c0_i32_0 : i32, i32
  }
  func.func @transform_7(%arg0: i32, %arg1: i32) -> (i32, i32) {
    %c0_i32 = arith.constant 0 : i32
    %c0_i32_0 = arith.constant 0 : i32
    %c0_i32_1 = arith.constant 0 : i32
    return %c0_i32, %c0_i32_0 : i32, i32
  }
  func.func @transform_8(%arg0: i32, %arg1: i32) -> (i32, i32) {
    %c0_i32 = arith.constant 0 : i32
    %c0_i32_0 = arith.constant 0 : i32
    %c0_i32_1 = arith.constant 0 : i32
    return %c0_i32, %c0_i32_0 : i32, i32
  }
  func.func @transform_9(%arg0: i32, %arg1: i32) -> (i32, i32) {
    %c0_i32 = arith.constant 0 : i32
    %c0_i32_0 = arith.constant 0 : i32
    %c0_i32_1 = arith.constant 0 : i32
    return %c0_i32, %c0_i32_0 : i32, i32
  }
  func.func @transform_10(%arg0: i32, %arg1: i32) -> (i32, i32) {
    %c0_i32 = arith.constant 0 : i32
    %c0_i32_0 = arith.constant 0 : i32
    %c0_i32_1 = arith.constant 0 : i32
    return %c0_i32, %c0_i32_0 : i32, i32
  }
  func.func @transform_11(%arg0: i32, %arg1: i32) -> (i32, i32, i32) {
    %c0_i32 = arith.constant 0 : i32
    %c0_i32_0 = arith.constant 0 : i32
    return %arg0, %arg1, %c0_i32 : i32, i32, i32
  }
  func.func @transform_12(%arg0: i32, %arg1: i32) -> (i32, i32, i32, i32) {
    %c0_i32 = arith.constant 0 : i32
    %c0_i32_0 = arith.constant 0 : i32
    %c0_i32_1 = arith.constant 0 : i32
    return %arg0, %c0_i32, %arg1, %c0_i32_0 : i32, i32, i32, i32
  }
}

</mosaic_0001>

<bundles_post_ra>
// kernel: tpu_custom_call.1
= control target key start
LH: loop header
LB: loop body
LE: loop exit
PB: predicated region body
PF: predicated region fallthrough
CT: control target
= control target key end

     0   :  { %s2229_s0 = inlined_call_operand.hbm [shape: f32[2,16,32], index: 0, kind: input, shape index: {}]   ;;  %s2230_s1 = inlined_call_operand.hbm [shape: f32[2,16,32], index: 1, kind: input, shape index: {}]   ;;  %s2231_s2 = inlined_call_operand.hbm [shape: f32[2,16,32], index: 2, kind: input, shape index: {}]   ;;  %s2232_s3 = inlined_call_operand.hbm [shape: f32[32,32], index: 3, kind: input, shape index: {}]   ;;  %s2233_s4 = inlined_call_operand.vmem [shape: f32[1,32], index: 4, kind: input, shape index: {}]   ;;  %s2234_s5 = inlined_call_operand.hbm [shape: f32[32,32], index: 5, kind: input, shape index: {}]   ;;  %s2235_s6 = inlined_call_operand.vmem [shape: f32[1,32], index: 6, kind: input, shape index: {}]   ;;  %s2236_s7 = inlined_call_operand.hbm [shape: f32[32,32], index: 7, kind: input, shape index: {}]   ;;  %s2237_s8 = inlined_call_operand.vmem [shape: f32[1,32], index: 8, kind: input, shape index: {}]   ;;  %s2238_s9 = inlined_call_operand.hbm [shape: f32[32,32], index: 9, kind: input, shape index: {}]   ;;  %s2239_s10 = inlined_call_operand.vmem [shape: f32[1,32], index: 10, kind: input, shape index: {}]   ;;  %s2240_s11 = inlined_call_operand.hbm [shape: f32[2,16,32], index: 11, kind: output, shape index: {0}]   ;;  %s2241_s12 = inlined_call_operand.hbm [shape: f32[2,2,16,16], index: 12, kind: output, shape index: {1}]  }
   0x1   :  { %2257 = sst [smem:[#allocation30_spill]] %s2229_s0 }
   0x2   :  { %2258 = sst [smem:[#allocation31_spill]] %s2230_s1 }
   0x3   :  { %2259 = sst [smem:[#allocation32_spill]] %s2232_s3 }
   0x4   :  { %2260 = sst [smem:[#allocation33_spill]] %s2234_s5 }
   0x5   :  { %2261 = sst [smem:[#allocation34_spill]] %s2236_s7 }
   0x6   :  { %2262 = sst [smem:[#allocation35_spill]] %s2239_s10 }
   0x7   :  { %2263 = sst [smem:[#allocation36_spill]] %s2240_s11 }
   0x8   :  { %2264 = sst [smem:[#allocation37_spill]] %s2241_s12 }
   0x9   :  { %18 = vsyncpa [#allocation3], 0 }
   0xa   :  { %20 = vsyncpa [#allocation3 + $0x1], 0 }
   0xb   :  { %21 = vsyncpa [#allocation6], 0 }
   0xc   :  { %23 = vsyncpa [#allocation6 + $0x1], 0 }
   0xd   :  { %24 = vsyncpa [#allocation9], 0 }
   0xe   :  { %25 = vsyncpa [#allocation12], 0 }
   0xf   :  { %26 = vsyncpa [#allocation4], 0 }
  0x10   :  { %28 = vsyncpa [#allocation4 + $0x1], 0 }
  0x11   :  { %29 = vsyncpa [#allocation16], 0 }
  0x12   :  { %31 = vsyncpa [#allocation16 + $0x1], 0  ;;  %s1896_s21 = smov 0   ;;  %s1898_s22 = smov 0  }
  0x13   :  { %s1900_s23 = smov 0   ;;  %s1902_s24 = smov 0  }
  0x14   :  { %s1904_s25 = smov 0   ;;  %s1906_s26 = smov 0  }
  0x15 LB: > { %2265 = sst [smem:[#allocation23_spill]] %s1799_s21  ;;  %s1927_s27 = sadd.s32 4294967295, %s1819_s26   ;;  %s1819_s26 = sphi %s1906_s26, %s37_s26   ;;  %s1815_s25 = sphi %s1904_s25, %s2297_s25   ;;  %s1811_s24 = sphi %s1902_s24, %s2296_s24   ;;  %s1807_s23 = sphi %s1900_s23, %s2300_s23   ;;  %s1803_s22 = sphi %s1898_s22, %s2299_s22   ;;  %s1799_s21 = sphi %s1896_s21, %s2298_s21  }
  0x16   : > { %2266 = sst [smem:[#allocation24_spill]] %s1815_s25  ;;  %s1273_s28 = sadd.s32 4294967294, %s1819_s26  }
  0x17   : > { %2267 = sst [smem:[#allocation25_spill]] %s1819_s26  ;;  %p71_p0 = scmp.ne.s32.totalorder %s1803_s22, %s1799_s21 }
  0x18   : > { %p72_p1 = scmp.eq.s32.totalorder %s1927_s27, 0  ;;  %p317_p2 = scmp.eq.s32.totalorder %s1927_s27, 1 }
  0x19   : > { %p323_p3 = scmp.eq.s32.totalorder %s1273_s28, 1  ;;  %p1274_p5 = scmp.ge.s32.totalorder %s1819_s26, 1 }
  0x1a   : > { %p1936_p4 = por %p72_p1, %p71_p0  ;;  %p358_p7 = scmp.lt.s32.totalorder %s1819_s26, 3 }
  0x1b   : > { %p1941_p6 = por %p323_p3, %p71_p0  ;;  %s2271_s3 = sld [smem:[#allocation32_spill]] }
  0x1c   : > { %p1949_p8 = pnand %p1274_p5, %p358_p7  ;;  %s1821_s17 = smov [#allocation8]  }
  0x1d   : > { %s2269_s30 = scalar_select %p1941_p6, 1, 0 }
  0x1e   : > { %p1360_p9 = pneg %p1949_p8  ;;  %s371_s18 = sshll.u32 %s1821_s17, 4  ;;  %s372_s18 = int_to_ptr.vmem [resolvable:$true] %s371_s18 }
  0x1f   : > { %2270 = sst [smem:[#allocation26_spill]] %s2269_s30  ;;  %s2243_s14 = smov 128  }
  0x20   : > { %p1957_p10 = pnand %p1360_p9, %p72_p1  ;;  %s2274_s7 = sld [smem:[#allocation34_spill]] }
  0x21   : > { %s369_s15 = sshll.u32 %s2271_s3, 4  ;;  %s2245_s17 = smov 8   ;;  %s370_s15 = int_to_ptr.hbm [resolvable:$true] %s369_s15 }
  0x22   : > { %1363 = dma.hbm_to_vmem [thread:$0]  (!%p1957_p10), %s370_s15, 512, %s372_s18, [#allocation9], %s2243_s14, %s2243_s14, %s2245_s17  }
  0x23   : > { %s1824_s3 = smov [#allocation11]   ;;  %s49_s20 = sadd.s32 1, %s1815_s25 }
  0x24   : > { %s405_s30 = sshll.u32 %s1824_s3, 4  ;;  %s58_s28 = sadd.s32 1, %s1807_s23  ;;  %s406_s30 = int_to_ptr.vmem [resolvable:$true] %s405_s30 }
  0x25   : > { %p51_p12 = scmp.ge.s32.totalorder %s49_s20, 2  ;;  %p65_p13 = scmp.ne.s32.totalorder %s1807_s23, %s1803_s22 }
  0x26   : > { %s403_s13 = sshll.u32 %s2274_s7, 4  ;;  %p66_p0 = scmp.eq.s32.totalorder %s1819_s26, 0  ;;  %s404_s13 = int_to_ptr.hbm [resolvable:$true] %s403_s13 }
  0x27   : > { %1369 = dma.hbm_to_vmem [thread:$0]  (!%p1957_p10), %s404_s13, 512, %s406_s30, [#allocation12], %s2243_s14, %s2243_s14, %s2245_s17  }
  0x28   : > { %p1394_p3 = scmp.lt.s32.totalorder %s1819_s26, 2  ;;  %s2302_s20 = smov (%p51_p12, %s49_s20), 0 }
  0x29   : > { %2275 = sst [smem:[#allocation27_spill]] %s2302_s20  ;;  %p67_p5 = por %p66_p0, %p65_p13 }
  0x2a   : > { %p1985_p7 = por %p317_p2, %p65_p13  ;;  %s53_s15 = ssub.s32 %s1815_s25, %s2302_s20 }
  0x2b   : > { %s2250_s18 = sand.u32 1, %s1807_s23   ;;  %p56_p9 = scmp.eq.s32.totalorder %s53_s15, 0 }
  0x2c   : > { %s2276_s3 = scalar_select %p1985_p7, 1, 0 }
  0x2d   : > { %s1994_s30 = sshll.u32 %s2250_s18, 4  ;;  %s1997_s13 = sshll.u32 %s1815_s25, 4 }
  0x2e   : > { %2277 = sst [smem:[#allocation28_spill]] %s2276_s3  ;;  %p1999_p11 = pnand %p1394_p3, %p67_p5 }
  0x2f   : > { %s2004_s17 = scalar_select %p56_p9, %s1807_s23, %s58_s28  }
  0x30   : > { %s463_s7 = sand.u32 1, %s1819_s26   ;;  %s2280_s1 = sld [smem:[#allocation31_spill]] }
  0x31   : > { %2279 = sst [smem:[#allocation29_spill]] %s2004_s17  ;;  %s467_s20 = scalar_lea.vmem [#allocation5], %s1994_s30 }
  0x32   : > { %s475_s18 = sshll.u32 %s467_s20, 4  ;;  %s2281_s5 = sld [smem:[#allocation33_spill]]  ;;  %s476_s18 = int_to_ptr.vmem [resolvable:$true] %s475_s18 }
  0x33   : > { %s2015_s28 = scalar_lea.sflag [#allocation6], %s463_s7  ;;  %s2282_s17 = smov 8  }
  0x34   : > { %s2283_s26 = smov 128   ;;  %s1825_s11 = smov [#allocation10]  }
  0x35   : > { %s388_s21 = sshll.u32 %s1825_s11, 4  ;;  %s1826_s7 = smov [#allocation13]   ;;  %s389_s21 = int_to_ptr.vmem [resolvable:$true] %s388_s21 }
  0x36   : > { %s472_s15 = scalar_lea.hbm %s2280_s1, %s1997_s13  ;;  %s420_s1 = sshll.u32 %s2238_s9, 4  ;;  %s421_s1 = int_to_ptr.hbm [resolvable:$true] %s420_s1 }
  0x37   : > { %s473_s10 = sshll.u32 %s472_s15, 4  ;;  %s2284_s0 = sld [smem:[#allocation30_spill]]  ;;  %s474_s10 = int_to_ptr.hbm [resolvable:$true] %s473_s10 }
  0x38   : > { %s386_s3 = sshll.u32 %s2281_s5, 4  ;;  %s443_s20 = scalar_lea.vmem [#allocation2], %s1994_s30  ;;  %s387_s3 = int_to_ptr.hbm [resolvable:$true] %s386_s3 }
  0x39   : > { %1379 = dma.hbm_to_vmem [thread:$0]  (!%p1999_p11), %s474_s10, 256, %s476_s18, %s2015_s28, %s2283_s26, %s2283_s26, %s2282_s17  }
  0x3a   : > { %1366 = dma.hbm_to_vmem [thread:$0]  (!%p1957_p10), %s387_s3, 512, %s389_s21, [#allocation9], %s2283_s26, %s2283_s26, %s2282_s17  }
  0x3b   : > { %s422_s10 = sshll.u32 %s1826_s7, 4  ;;  %s453_s15 = sshll.u32 %s443_s20, 4  ;;  %s423_s10 = int_to_ptr.vmem [resolvable:$true] %s422_s10  ;;  %s454_s15 = int_to_ptr.vmem [resolvable:$true] %s453_s15 }
  0x3c   : > { %1372 = dma.hbm_to_vmem [thread:$0]  (!%p1957_p10), %s421_s1, 512, %s423_s10, [#allocation12], %s2283_s26, %s2283_s26, %s2282_s17  }
  0x3d   : > { %s450_s18 = scalar_lea.hbm %s2284_s0, %s1997_s13  ;;  %s2285_s3 = sand.u32 1, %s1807_s23  }
  0x3e   : > { %s451_s11 = sshll.u32 %s450_s18, 4  ;;  %s440_s21 = scalar_lea.sflag [#allocation3], %s2285_s3  ;;  %s452_s11 = int_to_ptr.hbm [resolvable:$true] %s451_s11 }
  0x3f   : > { %1376 = dma.hbm_to_vmem [thread:$0]  (!%p1999_p11), %s452_s11, 256, %s454_s15, %s440_s21, %s2283_s26, %s2283_s26, %s2282_s17  }
  0x40   : > { %s494_s19 = scalar_lea.hbm %s2231_s2, %s1997_s13  ;;  %s489_s0 = scalar_lea.vmem [#allocation7], %s1994_s30 }
  0x41   : > { %s495_s25 = sshll.u32 %s494_s19, 4  ;;  %s497_s5 = sshll.u32 %s489_s0, 4  ;;  %s496_s25 = int_to_ptr.hbm [resolvable:$true] %s495_s25  ;;  %s498_s5 = int_to_ptr.vmem [resolvable:$true] %s497_s5 }
  0x42   : > { %1382 = dma.hbm_to_vmem [thread:$0]  (!%p1999_p11), %s496_s25, 256, %s498_s5, %s2015_s28, %s2283_s26, %s2283_s26, %s2282_s17  }
  0x43   : > { %509 = sbr.rel (%p1949_p8) target bundleno = 1135 (0x46f), region = 64  ;;  %s2062_s1 = sand.u32 (!%p1949_p8), 1, %s1803_s22  }
  0x44   : > { %s2065_s13 = sshll.u32 (!%p1949_p8), %s2062_s1, 4  ;;  %s512_s0 = scalar_lea.sflag (!%p1949_p8), [#allocation3], %s2062_s1 }
  0x45   : > { %s515_s30 = scalar_lea.vmem (!%p1949_p8), [#allocation2], %s2065_s13 }
  0x48   : > { %1774 = dma.done.wait (%p1936_p4), %s512_s0, 256  }
  0x49   : > { %1776 = vsyncadd (%p1936_p4), %s512_s0, 4294967040  ;;  %s521_s5 = sand.u32 1, %s1927_s27   ;;  %s525_s16 = scalar_lea.vmem [#allocation5], %s2065_s13 }
  0x4a   : > { %s522_s26 = scalar_lea.sflag [#allocation6], %s521_s5 }
  0x4b   : > { %1778 = dma.done.wait (%p1936_p4), %s522_s26, 512  }
  0x4c   : > { %1780 = vsyncadd (%p1936_p4), %s522_s26, 4294966784  ;;  %s535_s14 = scalar_lea.vmem [#allocation7], %s2065_s13 }
  0x4d   : > { %1782 = dma.done.wait (%p72_p1), [#allocation9], 1024  }
  0x4e   : > { %1784 = vsyncadd (%p72_p1), [#allocation9], 4294966272 }
  0x4f   : > { %1786 = dma.done.wait (%p72_p1), [#allocation12], 1024  }
  0x50   : > { %1788 = vsyncadd (%p72_p1), [#allocation12], 4294966272  ;;  %v664_v0 = vld [vmem:[#allocation10 + $0x18] sm:$0xff]  ;;  %v663_v1 = vld [vmem:[#allocation10 + $0x10] sm:$0xff]  ;;  %vm629_vm0 = vcmask 261120   ;;  %s1827_s17 = smov 112  }
  0x51   : > { %687 = vmatpush.msra.mxu1 %v664_v0  ;;  %v624_v2 = vld [vmem:[#allocation8 + $0x18] sm:$0xff]  ;;  %v662_v3 = vld [vmem:[#allocation10 + $0x8] sm:$0xff]  ;;  %v623_v4 = vld [vmem:[#allocation8 + $0x10] sm:$0xff]  ;;  %vm735_vm1 = vcmask 130048   ;;  %s1298_s20 = sshll.u32 %s2062_s1, 5  ;;  %s1828_s3 = smov 16  }
  0x52   : > { %648 = vmatpush.msra.mxu0 %v624_v2  ;;  %v661_v5 = vld [vmem:[#allocation10] sm:$0xff]  ;;  %v622_v6 = vld [vmem:[#allocation8 + $0x8] sm:$0xff]  ;;  %v701_v30 = vld [vmem:[#allocation11 + $0x18] sm:$0xff]  ;;  %s2142_s15 = scalar_lea.vmem [#allocation15], %s1298_s20  ;;  %s1333_s7 = sshll.u32 %s1811_s24, 5 }
  0x53   : > { %688 = vmatpush.msra.mxu1 %v663_v1  ;;  %v617_v7 = vld [vmem:[%s525_s16] sm:$0xff]  ;;  %v618_v10 = vld [vmem:[%s525_s16 + $0x8] sm:$0xff]  ;;  %724 = vmatpush.msra.mxu2 %v701_v30  ;;  %s2287_s25 = sld [smem:[#allocation37_spill]]  ;;  %s1065_s5 = sshll.u32 %s2142_s15, 4  ;;  %s1066_s5 = int_to_ptr.vmem [resolvable:$true] %s1065_s5 }
  0x54   : > { %649 = vmatpush.msra.mxu0 %v623_v4  ;;  %v621_v8 = vld [vmem:[#allocation8] sm:$0xff]  ;;  %v616_v11 = vld [vmem:[%s515_s30 + $0x8] sm:$0xff]  ;;  %v700_v31 = vld [vmem:[#allocation11 + $0x10] sm:$0xff]  ;;  %s1032_s16 = scalar_lea.sflag [#allocation16], %s2062_s1 }
  0x55   : > { %689 = vmatpush.msra.mxu1 %v662_v3  ;;  %v615_v9 = vld [vmem:[%s515_s30] sm:$0xff]  ;;  %v699_v32 = vld [vmem:[#allocation11 + $0x8] sm:$0xff]  ;;  %725 = vmatpush.msra.mxu2 %v700_v31 }
  0x56   : > { %650 = vmatpush.msra.mxu0 %v622_v6  ;;  %v1464_v12 = vld [vmem:[%s2233_s4] ss:$0 sm:$0xff]  ;;  %v620_v35 = vld [vmem:[%s535_s14 + $0x8] sm:$0xff] }
  0x57   : > { %690 = vmatpush.msra.mxu1 %v661_v5  ;;  %v1463_v17 = vld [vmem:[%s2235_s6] ss:$0 sm:$0xff]  ;;  %726 = vmatpush.msra.mxu2 %v699_v32 }
  0x58   : > { %1301 = vmatmul.msk.f32.vlgmr.msra.gmra.mxu1 %vm629_vm0, %v617_v7  ;;  %651 = vmatpush.msra.mxu0 %v621_v8  ;;  %v698_v33 = vld [vmem:[#allocation11] sm:$0xff] }
  0x59   : > { %1299 = vmatmul.msk.f32.vlgmr.msra.gmra.mxu0 %vm629_vm0, %v615_v9  ;;  %v619_v34 = vld [vmem:[%s535_s14] sm:$0xff]  ;;  %727 = vmatpush.msra.mxu2 %v698_v33  ;;  %s2288_s0 = smov %s2287_s25  ;;  %s1064_s30 = scalar_lea.hbm %s2287_s25, %s1333_s7 }
  0x5a   : > { %1303 = vmatmul.msk.f32.vlgmr.msra.gmra.mxu2 %vm629_vm0, %v619_v34  ;;  %v1465_v46 = vld [vmem:[%s2237_s8] ss:$0 sm:$0xff]  ;;  %s1067_s26 = sshll.u32 %s1064_s30, 4  ;;  %s1713_s28 = scalar_lea.hbm %s2288_s0, 64  ;;  %s1068_s26 = int_to_ptr.hbm [resolvable:$true] %s1067_s26 }
  0x5b   : > { %s1707_s14 = sshra.s32 %s1068_s26, 4  ;;  %s1708_s14 = int_to_ptr.hbm [resolvable:$true] %s1707_s14 }
  0x5c   : > { %s1709_s27 = scalar_lea.hbm %s1708_s14, 32  ;;  %p1714_p8 = scmp.lt.s32.totalorder %s1708_s14, %s2288_s0 }
  0x5d   : > { %p1710_p1 = scmp.ne.s32.totalorder %s1708_s14, %s1709_s27  ;;  %p1715_p10 = scmp.lt.s32.totalorder %s1713_s28, %s1709_s27 }
  0x5f   : > { %p1711_p2 = pnand %p1710_p1, %p1985_p7  ;;  %p1716_p11 = por %p1715_p10, %p1714_p8 }
  0x60   : > { %1302 = vmatmul.msk.f32.gmra.mxu1 %vm629_vm0, %v618_v10 }
  0x61   : > { %1300 = vmatmul.msk.f32.gmra.mxu0 %vm629_vm0, %v616_v11  ;;  %p1712_p4 = pneg %p1711_p2 }
  0x62   : > { %1304 = vmatmul.msk.f32.gmra.mxu2 %vm629_vm0, %v620_v35 }
  0x63   : > { %p1717_p12 = pnand %p1716_p11, %p1712_p4 }
  0xd5   : > { %v692_v13 = vpop.f32.mrf.mxu1 }
  0xd6   : > { %v653_v14 = vpop.f32.mrf.mxu0  ;;  %v693_v23 = vadd.f32 %v1463_v17, %v692_v13 }
  0xd7   : > { %v654_v15 = vadd.f32 %v1464_v12, %v653_v14 }
  0xd9   : > { %v659_v16 = vmul.f32 0.17677669, %v654_v15 }
  0xdb   : > { %850 = vrot.lane.b32.xlu1 %v659_v16, %s1827_s17 }
  0xdd   : > { %v695_v18 = vpop.f32.mrf.mxu1  ;;  %v729_v42 = vpop.f32.mrf.mxu2 }
  0xde   : > { %v696_v19 = vadd.f32 %v1463_v17, %v695_v18  ;;  %v656_v20 = vpop.f32.mrf.mxu0  ;;  %v730_v49 = vadd.f32 %v1465_v46, %v729_v42 }
  0xdf   : > { %v657_v21 = vadd.f32 %v1464_v12, %v656_v20 }
  0xe0   : > { %856 = vrot.lane.b32.xlu0 %v696_v19, %s1827_s17  ;;  %1305 = vmatpush.xpose.msk.msra.mxu3 %vm735_vm1, %v696_v19 }
  0xe1   : > { %v660_v22 = vmul.f32 0.17677669, %v657_v21 }
  0xe3   : > { %852 = vrot.lane.b32.xlu1 %v660_v22, %s1827_s17 }
  0xe4   : > { %1306 = vmatpush.xpose.msk.msra.mxu3 %vm735_vm1, %v693_v23 }
  0xe5   : > { %v732_v47 = vpop.f32.mrf.mxu2 }
  0xe6   : > { %v733_v50 = vadd.f32 %v1465_v46, %v732_v47 }
  0xe7   : > { %1307 = vmatmul.msk.f32.vlgmr.msra.gmra.mxu3 %vm735_vm1, %v659_v16 }
  0xe8   : > { %854 = vrot.lane.b32.xlu0 %v693_v23, %s1827_s17  ;;  %841 = vmatpush.msrb.mxu0 %v733_v50  ;;  %v1458_v62 = vpack.i.bf16 %v730_v49, %v733_v50 }
  0xea   : > { %842 = vmatpush.msrb.mxu0 %v730_v49 }
  0xef   : > { %1308 = vmatmul.msk.f32.gmra.mxu3 %vm735_vm1, %v660_v22 }
 0x14d   : > { %v851_v25 = vpop.permute.xlu1 %850 }
 0x152   : > { %v857_v24 = vpop.permute.xlu0 %856 }
 0x153   : > { %1311 = vmatpush.xpose.msk.msrb.mxu1 %vm735_vm1, %v857_v24 }
 0x155   : > { %v853_v27 = vpop.permute.xlu1 %852 }
 0x15a   : > { %v855_v26 = vpop.permute.xlu0 %854 }
 0x15b   : > { %1312 = vmatpush.xpose.msk.msrb.mxu1 %vm735_vm1, %v855_v26 }
 0x15e   : > { %1313 = vmatmul.msk.f32.vlgmr.msrb.gmra.mxu1 %vm735_vm1, %v851_v25 }
 0x166   : > { %1314 = vmatmul.msk.f32.gmra.mxu1 %vm735_vm1, %v853_v27 }
 0x16a   : > { %v765_v28 = vpop.f32.mrf.mxu3 }
 0x16b   : > { %v771_v29 = vsel %vm735_vm1, %v765_v28, -inf }
 0x16c   : > { %772 = vmax.xlane.f32.xlu0 %v771_v29 }
 0x172   : > { %v768_v40 = vpop.f32.mrf.mxu3 }
 0x173   : > { %v774_v41 = vsel %vm735_vm1, %v768_v40, -inf }
 0x1db   : > { %v883_v36 = vpop.f32.mrf.mxu1 }
 0x1dc   : > { %v889_v37 = vsel %vm735_vm1, %v883_v36, -inf }
 0x1dd   : > { %890 = vmax.xlane.f32.xlu2 %v889_v37 }
 0x1df   : > { %v773_v63 = vpop.xlane.xlu0 %772 }
 0x1e0   : > { %v777_v0 = vsub.f32 %v765_v28, %v773_v63 }
 0x1e2   : > { %v779_v1 = vmul.f32 1.442695, %v777_v0 }
 0x1e3   : > { %v886_v38 = vpop.f32.mrf.mxu1 }
 0x1e4   : > { %v892_v39 = vsel %vm735_vm1, %v886_v38, -inf }
 0x1e5   : > { %893 = vmax.xlane.f32.xlu2 %v892_v39 }
 0x1ed   : > { %775 = vmax.xlane.f32.xlu2 %v774_v41 }
 0x250   : > { %v891_v43 = vpop.xlane.xlu2 %890 }
 0x251   : > { %v895_v44 = vsub.f32 %v883_v36, %v891_v43 }
 0x253   : > { %v897_v45 = vmul.f32 1.442695, %v895_v44 }
 0x255   : > { %1467 = vpow2.f32 %v897_v45 }
 0x258   : > { %v894_v48 = vpop.xlane.xlu2 %893 }
 0x259   : > { %v896_v51 = vsub.f32 %v886_v38, %v894_v48 }
 0x25b   : > { %v1468_v52 = vpop.eup %1467  ;;  %v899_v53 = vmul.f32 1.442695, %v896_v51 }
 0x25c   : > { %v901_v54 = vsel %vm735_vm1, %v1468_v52, 0.0 }
 0x25d   : > { %1469 = vpow2.f32 %v899_v53  ;;  %902 = vadd.xlane.f32.xlu1 %v901_v54 }
 0x260   : > { %v776_v55 = vpop.xlane.xlu2 %775 }
 0x261   : > { %v778_v56 = vsub.f32 %v768_v40, %v776_v55 }
 0x263   : > { %v2128_v57 = vpop.eup %1469  ;;  %v781_v58 = vmul.f32 1.442695, %v778_v56 }
 0x264   : > { %v904_v59 = vsel %vm735_vm1, %v2128_v57, 0.0 }
 0x265   : > { %1471 = vpow2.f32 %v781_v58  ;;  %905 = vadd.xlane.f32.xlu2 %v904_v59  ;;  %v989_v58 = vld [vmem:[#allocation13 + $0x10] sm:$0xff]  ;;  %v988_v59 = vld [vmem:[#allocation13 + $0x8] sm:$0xff] }
 0x266   : > { %1473 = vpow2.f32 %v779_v1 }
 0x26b   : > { %v2132_v60 = vpop.eup %1471 }
 0x26c   : > { %v786_v61 = vsel %vm735_vm1, %v2132_v60, 0.0  ;;  %v2137_v2 = vpop.eup %1473 }
 0x26d   : > { %787 = vadd.xlane.f32.xlu0 %v786_v61  ;;  %v783_v3 = vsel %vm735_vm1, %v2137_v2, 0.0 }
 0x27d   : > { %1459 = vrot.lane.b32.xlu2 %v1458_v62, %s1827_s17 }
 0x2a6   : > { %784 = vadd.xlane.f32.xlu2 %v783_v3 }
 0x2d0   : > { %v903_v4 = vpop.xlane.xlu1 %902 }
 0x2d1   : > { %1475 = vrcp.f32 %v903_v4  ;;  %v918_v10 = vand.u32 2147483648, %v903_v4  ;;  %v916_v11 = vand.u32 2147483647, %v903_v4  ;;  %vm912_vm3 = vweird.f32 %v903_v4 }
 0x2d3   : > { %v919_v14 = vor.u32 1.1754944e-38, %v918_v10  ;;  %vm917_vm5 = vcmp.eq.f32.partialorder %v916_v11, 8.507059e+37 }
 0x2d7   : > { %v1476_v5 = vpop.eup %1475 }
 0x2d8   : > { %v908_v6 = vmul.f32 %v1476_v5, %v903_v4  ;;  %v906_v7 = vpop.xlane.xlu2 %905  ;;  %vm913_vm2 = vweird.f32 %v1476_v5 }
 0x2d9   : > { %1477 = vrcp.f32 %v906_v7  ;;  %vm914_vm4 = vmor %vm912_vm3, %vm913_vm2  ;;  %v933_v22 = vand.u32 2147483648, %v906_v7  ;;  %v931_v26 = vand.u32 2147483647, %v906_v7  ;;  %vm927_vm7 = vweird.f32 %v906_v7 }
 0x2da   : > { %v909_v8 = vsub.f32 1.0, %v908_v6 }
 0x2db   : > { %v934_v29 = vor.u32 1.1754944e-38, %v933_v22  ;;  %vm932_vm9 = vcmp.eq.f32.partialorder %v931_v26, 8.507059e+37 }
 0x2dc   : > { %v910_v9 = vmul.f32 %v1476_v5, %v909_v8 }
 0x2de   : > { %v911_v12 = vadd.f32 %v1476_v5, %v910_v9 }
 0x2df   : > { %v1478_v13 = vpop.eup %1477 }
 0x2e0   : > { %v923_v15 = vmul.f32 %v1478_v13, %v906_v7  ;;  %v788_v16 = vpop.xlane.xlu0 %787  ;;  %v1460_v17 = vpop.permute.xlu2 %1459  ;;  %v915_v18 = vsel %vm914_vm4, %v1476_v5, %v911_v12  ;;  %vm928_vm6 = vweird.f32 %v1478_v13 }
 0x2e1   : > { %1479 = vrcp.f32 %v788_v16  ;;  %v1461_v19 = vunpack.i.l.bf16 %v1460_v17  ;;  %v920_v21 = vsel %vm917_vm5, %v919_v14, %v915_v18  ;;  %v1462_v23 = vunpack.i.h.bf16 %v1460_v17  ;;  %vm929_vm8 = vmor %vm927_vm7, %vm928_vm6 }
 0x2e2   : > { %v924_v20 = vsub.f32 1.0, %v923_v15  ;;  %v921_v24 = vmul.f32 %v1468_v52, %v920_v21  ;;  %v815_v35 = vand.u32 2147483648, %v788_v16  ;;  %v813_v37 = vand.u32 2147483647, %v788_v16 }
 0x2e3   : > { %968 = vmatpush.msrb.mxu2 %v1461_v19  ;;  %vm809_vm11 = vweird.f32 %v788_v16 }
 0x2e4   : > { %v925_v25 = vmul.f32 %v1478_v13, %v924_v20  ;;  %1315 = vst.msk [vmem:[%s2142_s15 + $0x10] sm:$0xff] %vm735_vm1, %v921_v24  ;;  %v816_v39 = vor.u32 1.1754944e-38, %v815_v35  ;;  %vm814_vm13 = vcmp.eq.f32.partialorder %v813_v37, 8.507059e+37 }
 0x2e5   : > { %969 = vmatpush.msrb.mxu2 %v1462_v23 }
 0x2e6   : > { %1317 = vmatmul.msk.f32.vlgmr.msrb.gmra.mxu2 %vm735_vm1, %v921_v24  ;;  %v926_v27 = vadd.f32 %v1478_v13, %v925_v25 }
 0x2e7   : > { %v1480_v28 = vpop.eup %1479 }
 0x2e8   : > { %v805_v30 = vmul.f32 %v1480_v28, %v788_v16  ;;  %v930_v31 = vsel %vm929_vm8, %v1478_v13, %v926_v27  ;;  %vm810_vm10 = vweird.f32 %v1480_v28 }
 0x2e9   : > { %v935_v32 = vsel %vm932_vm9, %v934_v29, %v930_v31  ;;  %vm811_vm12 = vmor %vm809_vm11, %vm810_vm10 }
 0x2ea   : > { %v806_v33 = vsub.f32 1.0, %v805_v30  ;;  %v936_v34 = vmul.f32 %v2128_v57, %v935_v32  ;;  %v990_v57 = vld [vmem:[#allocation13 + $0x18] sm:$0xff] }
 0x2eb   : > { %1013 = vmatpush.msrb.mxu3 %v990_v57 }
 0x2ec   : > { %v807_v36 = vmul.f32 %v1480_v28, %v806_v33  ;;  %1316 = vst.msk [vmem:[%s2142_s15 + $0x18] sm:$0xff] %vm735_vm1, %v936_v34 }
 0x2ed   : > { %1014 = vmatpush.msrb.mxu3 %v989_v58 }
 0x2ee   : > { %1318 = vmatmul.msk.f32.gmra.mxu2 %vm735_vm1, %v936_v34  ;;  %v808_v38 = vadd.f32 %v1480_v28, %v807_v36 }
 0x2ef   : > { %1015 = vmatpush.msrb.mxu3 %v988_v59 }
 0x2f0   : > { %v812_v40 = vsel %vm811_vm12, %v1480_v28, %v808_v38 }
 0x2f1   : > { %v817_v41 = vsel %vm814_vm13, %v816_v39, %v812_v40 }
 0x2f2   : > { %v818_v42 = vmul.f32 %v2132_v60, %v817_v41  ;;  %v987_v60 = vld [vmem:[#allocation13] sm:$0xff] }
 0x2f3   : > { %1016 = vmatpush.msrb.mxu3 %v987_v60 }
 0x2f4   : > { %820 = vst.msk [vmem:[%s2142_s15 + $0x8] sm:$0xff] %vm735_vm1, %v818_v42 }
 0x319   : > { %v785_v43 = vpop.xlane.xlu2 %784 }
 0x31a   : > { %1481 = vrcp.f32 %v785_v43  ;;  %v800_v47 = vand.u32 2147483648, %v785_v43  ;;  %v798_v49 = vand.u32 2147483647, %v785_v43  ;;  %vm794_vm15 = vweird.f32 %v785_v43 }
 0x31c   : > { %v801_v51 = vor.u32 1.1754944e-38, %v800_v47  ;;  %vm799_vm3 = vcmp.eq.f32.partialorder %v798_v49, 8.507059e+37 }
 0x320   : > { %v1482_v44 = vpop.eup %1481 }
 0x321   : > { %v790_v45 = vmul.f32 %v1482_v44, %v785_v43  ;;  %vm795_vm14 = vweird.f32 %v1482_v44 }
 0x322   : > { %vm796_vm2 = vmor %vm794_vm15, %vm795_vm14 }
 0x323   : > { %v791_v46 = vsub.f32 1.0, %v790_v45 }
 0x325   : > { %v792_v48 = vmul.f32 %v1482_v44, %v791_v46 }
 0x327   : > { %v793_v50 = vadd.f32 %v1482_v44, %v792_v48 }
 0x329   : > { %v797_v52 = vsel %vm796_vm2, %v1482_v44, %v793_v50 }
 0x32a   : > { %v802_v53 = vsel %vm799_vm3, %v801_v51, %v797_v52 }
 0x32b   : > { %v803_v54 = vmul.f32 %v2137_v2, %v802_v53 }
 0x32d   : > { %819 = vst.msk [vmem:[%s2142_s15] sm:$0xff] %vm735_vm1, %v803_v54  ;;  %1309 = vmatmul.msk.f32.vlgmr.msrb.gmra.mxu0 %vm735_vm1, %v803_v54 }
 0x335   : > { %1310 = vmatmul.msk.f32.gmra.mxu0 %vm735_vm1, %v818_v42 }
 0x369   : > { %v971_v55 = vpop.f32.mrf.mxu2 }
 0x36a   : > { %979 = vrot.lane.b32.xlu1 %v971_v55, %s1828_s3 }
 0x371   : > { %v974_v56 = vpop.f32.mrf.mxu2 }
 0x372   : > { %981 = vrot.lane.b32.xlu0 %v974_v56, %s1828_s3 }
 0x3aa   : > { %v844_v61 = vpop.f32.mrf.mxu0 }
 0x3b2   : > { %v847_v0 = vpop.f32.mrf.mxu0 }
 0x3dc   : > { %v980_v62 = vpop.permute.xlu1 %979 }
 0x3dd   : > { %v985_v63 = vsel %vm735_vm1, %v844_v61, %v980_v62 }
 0x3de   : > { %1319 = vmatmul.msk.f32.vlgmr.msrb.gmra.mxu3 %vm629_vm0, %v985_v63 }
 0x3e4   : > { %v982_v1 = vpop.permute.xlu0 %981 }
 0x3e5   : > { %v986_v2 = vsel %vm735_vm1, %v847_v0, %v982_v1 }
 0x3e6   : > { %1320 = vmatmul.msk.f32.gmra.mxu3 %vm629_vm0, %v986_v2 }
 0x3e7   : > { %1720 = shalt.err (!%p1717_p12)
}
 0x3e8   : > { %s1829_s11 = smov 128   ;;  %s1830_s20 = smov 8  }
 0x3e9   : > { %1357 = dma.vmem_to_hbm [thread:$0]  (%p1985_p7), %s1066_s5, 512, %s1068_s26, %s1032_s16, %s1829_s11, %s1829_s11, %s1830_s20  }
 0x3ea   : > { %s2289_s7 = sld [smem:[#allocation35_spill]]  ;;  %s1332_s12 = sshll.u32 %s1811_s24, 4 }
 0x3eb   : > { %s604_s19 = scalar_lea.vmem [#allocation14], %s2065_s13  ;;  %s2290_s14 = sld [smem:[#allocation36_spill]] }
 0x3ec   : > { %s1046_s29 = sshll.u32 %s604_s19, 4  ;;  %s1027_s5 = scalar_lea.sflag [#allocation4], %s2062_s1  ;;  %s1047_s29 = int_to_ptr.vmem [resolvable:$true] %s1046_s29 }
 0x3f0   : > { %v1466_v3 = vld [vmem:[%s2289_s7] ss:$0 sm:$0xff] }
 0x3f1   : > { %s1045_s27 = scalar_lea.hbm %s2290_s14, %s1332_s12  ;;  %s1741_s28 = scalar_lea.hbm %s2290_s14, 32 }
 0x3f2   : > { %s1048_s17 = sshll.u32 %s1045_s27, 4  ;;  %s1049_s17 = int_to_ptr.hbm [resolvable:$true] %s1048_s17 }
 0x3f3   : > { %s1735_s26 = sshra.s32 %s1049_s17, 4  ;;  %s1736_s26 = int_to_ptr.hbm [resolvable:$true] %s1735_s26 }
 0x3f4   : > { %s1737_s24 = scalar_lea.hbm %s1736_s26, 16  ;;  %p1742_p5 = scmp.lt.s32.totalorder %s1736_s26, %s2290_s14 }
 0x3f5   : > { %p1738_p13 = scmp.ne.s32.totalorder %s1736_s26, %s1737_s24  ;;  %p1743_p9 = scmp.lt.s32.totalorder %s1741_s28, %s1737_s24 }
 0x3f7   : > { %p1739_p0 = pnand %p1738_p13, %p1985_p7  ;;  %p1744_p1 = por %p1743_p9, %p1742_p5 }
 0x3f9   : > { %p1740_p3 = pneg %p1739_p0 }
 0x3fb   : > { %p1745_p2 = pnand %p1744_p1, %p1740_p3 }
 0x461   : > { %v1018_v4 = vpop.f32.mrf.mxu3 }
 0x462   : > { %v1019_v5 = vadd.f32 %v1466_v3, %v1018_v4 }
 0x464   : > { %1024 = vst.msk [vmem:[%s604_s19] sm:$0xff] %vm629_vm0, %v1019_v5 }
 0x469   : > { %v1021_v6 = vpop.f32.mrf.mxu3 }
 0x46a   : > { %v1022_v7 = vadd.f32 %v1466_v3, %v1021_v6 }
 0x46c   : > { %1025 = vst.msk [vmem:[%s604_s19 + $0x8] sm:$0xff] %vm629_vm0, %v1022_v7 }
 0x46d   : > { %1748 = shalt.err (!%p1745_p2)
}
 0x46e   : > { %1356 = dma.vmem_to_hbm [thread:$0]  (%p1985_p7), %s1047_s29, 256, %s1049_s17, %s1027_s5, %s1829_s11, %s1829_s11, %s1830_s20  }
 0x46f PF: > { %s2291_s1 = sld [smem:[#allocation23_spill]] }
 0x470   : > { %s2293_s3 = sld [smem:[#allocation25_spill]] }
 0x475   : > { %s1082_s7 = sand.u32 1, %s2291_s1  }
 0x476   : > { %p2294_p4 = scmp.ge.s32.totalorder %s2293_s3, 2  ;;  %s1083_s12 = scalar_lea.sflag [#allocation4], %s1082_s7 }
 0x478   : > { %p1384_p8 = pnand %p2294_p4, %p1941_p6 }
 0x47a   : > { %p1385_p10 = pneg %p1384_p8 }
 0x47c   : > { %1790 = dma.done.wait (%p1385_p10), %s1083_s12, 256  }
 0x47d   : > { %1792 = vsyncadd (%p1385_p10), %s1083_s12, 4294967040  ;;  %s1093_s19 = scalar_lea.sflag [#allocation16], %s1082_s7 }
 0x47e   : > { %1794 = dma.done.wait (%p1385_p10), %s1093_s19, 512  }
 0x47f   : > { %1796 = vsyncadd (%p1385_p10), %s1093_s19, 4294966784  ;;  %s37_s26 = sadd.s32 1, %s2293_s3   ;;  %s2295_s11 = sld [smem:[#allocation29_spill]] }
 0x480   : > { %p34_p11 = scmp.ge.s32.totalorder %s37_s26, 4   ;;  %s2296_s24 = sld [smem:[#allocation24_spill]] }
 0x481   : > { %s2297_s25 = sld [smem:[#allocation27_spill]]  ;;  %s2298_s21 = smov %s1803_s22 }
 0x482   : > { %s2299_s22 = smov %s1807_s23  ;;  %36 = sbr.rel (!%p34_p11) target bundleno = 21 (0x15), region = 167 }
 0x485   : > { %s2300_s23 = smov %s2295_s11 }
 0x487   :  { %1099 = vsyncpa [#allocation3], 1 }
 0x488   :  { %1101 = vsyncpa [#allocation3 + $0x1], 1 }
 0x489   :  { %1102 = vsyncpa [#allocation6], 1 }
 0x48a   :  { %1104 = vsyncpa [#allocation6 + $0x1], 1 }
 0x48b   :  { %1105 = vsyncpa [#allocation9], 1 }
 0x48c   :  { %1106 = vsyncpa [#allocation12], 1 }
 0x48d   :  { %1107 = vsyncpa [#allocation4], 1 }
 0x48e   :  { %1109 = vsyncpa [#allocation4 + $0x1], 1 }
 0x48f   :  { %1110 = vsyncpa [#allocation16], 1 }
 0x490   :  { %1112 = vsyncpa [#allocation16 + $0x1], 1 }

</bundles_post_ra>
